<compile_context>
chip_gen: v5e
topology: v5e:2x2
jax: 0.10.0
libtpu: 0.0.40
codegen_flags: <defaults>
</compile_context>

<pallas_src>
import jax
import jax.numpy as jnp
from jax.experimental import pallas as pl
from jax.experimental.pallas import tpu as pltpu

NEGATIVE_SLOPE = -0.1  # matches the PyTorch spec (negative_slope = -0.1)


def _fused_kernel(x_ref, wt_ref, b_ref, o_ref):
    # x_ref : (N, C_in, HW)   wt_ref : (N, C_out, C_in)   b_ref : (C_out, HW)
    # Single batched contraction over the channel dim -> (N, C_out, HW).
    h = jnp.einsum('noc,nck->nok', wt_ref[...], x_ref[...],
                   preferred_element_type=jnp.float32)
    h = h + b_ref[...]                       # one bias add (broadcast over N)
    o_ref[...] = jnp.where(h > 0, h, h * NEGATIVE_SLOPE).astype(o_ref.dtype)


def fold_params(w1, b1, w2, b2, w3, b3, *, n_batch, hw):
    """One-time fold of the three 1x1 transposed convs into a single affine map.

    Runs ONCE outside the jitted forward, so the tiny 19x64/64x19/19x19 folds
    and the bias broadcast are never re-executed per call — the per-call graph
    is reshape + a single pallas_call.
    """
    w_fused = (w1 @ w2) @ w3                   # (C_in, C_out)
    b_fused = (b1 @ w2 + b2) @ w3 + b3         # (C_out,)
    c_in, c_out = w_fused.shape
    # Pre-broadcast: weight replicated over the (tiny) batch so the kernel is a
    # plain batched matmul; bias pre-broadcast to lane width HW.
    wt = jnp.broadcast_to(w_fused.T, (n_batch, c_out, c_in))    # (N, C_out, C_in)
    b_bcast = jnp.broadcast_to(b_fused[:, None], (c_out, hw))   # (C_out, HW)
    return jnp.asarray(wt), jnp.asarray(b_bcast)


@jax.jit
def fused_forward(x_nchw, wt, b_bcast):
    """x_nchw: (N, 19, H, W) float32.  Returns (N, 19, H, W) (NCHW)."""
    N, C_in, H, W = x_nchw.shape
    C_out, HW = b_bcast.shape

    x_chw = x_nchw.reshape(N, C_in, HW)        # free reshape, stays NCHW

    vmem = pl.BlockSpec(memory_space=pltpu.MemorySpace.VMEM)
    flops = 2 * N * C_out * C_in * HW + 2 * N * C_out * HW
    bytes_accessed = 4 * (N * C_in * HW + N * C_out * C_in
                          + C_out * HW + N * C_out * HW)

    out_chw = pl.pallas_call(
        _fused_kernel,
        out_shape=jax.ShapeDtypeStruct((N, C_out, HW), jnp.float32),
        in_specs=[vmem, vmem, vmem],
        out_specs=vmem,
        cost_estimate=pl.CostEstimate(
            flops=flops, transcendentals=0, bytes_accessed=bytes_accessed),
    )(x_chw, wt, b_bcast)

    return out_chw.reshape(N, C_out, H, W)


def init_params(key):
    # ConvTranspose2d weights: (C_in, C_out, 1, 1) -> squeezed to (C_in, C_out).
    k1, k2, k3, k4, k5, k6 = jax.random.split(key, 6)

    def u(k, shape, fan_in):
        bound = 1.0 / (fan_in ** 0.5)
        return jax.random.uniform(k, shape, jnp.float32, -bound, bound)

    w1 = u(k1, (19, 64), 19); b1 = u(k2, (64,), 19)
    w2 = u(k3, (64, 19), 64); b2 = u(k4, (19,), 64)
    w3 = u(k5, (19, 19), 19); b3 = u(k6, (19,), 19)
    return w1, b1, w2, b2, w3, b3


if __name__ == "__main__":
    key = jax.random.PRNGKey(0)
    kx, kp = jax.random.split(key)
    x6 = jax.random.normal(kx, (2, 19, 4, 4), jnp.float32)
    w1, b1, w2, b2, w3, b3 = init_params(kp)

    N, _, H, W = x6.shape
    # One-time fold (outside jit; reused across all subsequent calls).
    wt, b_bcast = fold_params(w1, b1, w2, b2, w3, b3, n_batch=N, hw=H * W)
    wt, b_bcast = jax.block_until_ready((wt, b_bcast))

    out = jax.block_until_ready(fused_forward(x6, wt, b_bcast))

    # Reference: unfused chained computation in plain JAX (matches PyTorch
    # Model.forward semantics with 1x1 transposed convs + where(x>0, x, x*s)).
    xr = jnp.transpose(x6, (0, 2, 3, 1)).reshape(-1, 19)
    h = xr @ w1 + b1
    h = h @ w2 + b2
    h = h @ w3 + b3
    ref = jnp.where(h > 0, h, h * NEGATIVE_SLOPE)
    ref = jnp.transpose(ref.reshape(N, H, W, 19), (0, 3, 1, 2))

    assert out.shape == (2, 19, 4, 4)
    assert jnp.allclose(out, ref, atol=1e-4, rtol=1e-4)

    print("KERNEL_OK")
</pallas_src>

<mosaic_0001>
module attributes {stable_mosaic.version = 11 : i64} {
  func.func @_fused_kernel(%arg0: memref<2x19x16xf32, #tpu.memory_space<vmem>>, %arg1: memref<2x19x19xf32, #tpu.memory_space<vmem>>, %arg2: memref<19x16xf32, #tpu.memory_space<vmem>>, %arg3: memref<2x19x16xf32, #tpu.memory_space<vmem>>) attributes {dimension_semantics = [], scalar_prefetch = 0 : i64, scratch_operands = 0 : i64, tpu.core_type = #tpu.core_type<tc>} {
    %c0 = arith.constant 0 : index
    %c0_0 = arith.constant 0 : index
    %c0_1 = arith.constant 0 : index
    %0 = vector.load %arg1[%c0, %c0_0, %c0_1] : memref<2x19x19xf32, #tpu.memory_space<vmem>>, vector<2x19x19xf32>
    %c0_2 = arith.constant 0 : index
    %c0_3 = arith.constant 0 : index
    %c0_4 = arith.constant 0 : index
    %1 = vector.load %arg0[%c0_2, %c0_3, %c0_4] : memref<2x19x16xf32, #tpu.memory_space<vmem>>, vector<2x19x16xf32>
    "tpu.trace_start"() <{level = 10 : i32, message = "noc,nck->nok"}> : () -> ()
    %cst = arith.constant dense<0.000000e+00> : vector<2x19x16xf32>
    %2 = tpu.matmul %0, %1, %cst {dimension_numbers = #tpu.dot_dimension_numbers<[2], [1], [1], [2], [0, 0, 0, 1, 1, 2], [0], [0]>} : vector<2x19x19xf32>, vector<2x19x16xf32>, vector<2x19x16xf32> -> vector<2x19x16xf32>
    "tpu.trace_stop"() : () -> ()
    %c0_5 = arith.constant 0 : index
    %c0_6 = arith.constant 0 : index
    %3 = vector.load %arg2[%c0_5, %c0_6] : memref<19x16xf32, #tpu.memory_space<vmem>>, vector<19x16xf32>
    %4 = vector.shape_cast %3 : vector<19x16xf32> to vector<1x19x16xf32>
    %5 = vector.broadcast %4 : vector<1x19x16xf32> to vector<2x19x16xf32>
    %6 = arith.addf %2, %5 : vector<2x19x16xf32>
    %cst_7 = arith.constant 0.000000e+00 : f32
    %7 = vector.broadcast %cst_7 : f32 to vector<2x19x16xf32>
    %8 = arith.cmpf ogt, %6, %7 : vector<2x19x16xf32>
    %cst_8 = arith.constant -1.000000e-01 : f32
    %9 = vector.broadcast %cst_8 : f32 to vector<2x19x16xf32>
    %10 = arith.mulf %6, %9 : vector<2x19x16xf32>
    %11 = arith.select %8, %6, %10 : vector<2x19x16xi1>, vector<2x19x16xf32>
    %c0_9 = arith.constant 0 : index
    %c0_10 = arith.constant 0 : index
    %c0_11 = arith.constant 0 : index
    %12 = vector.load %arg3[%c0_9, %c0_10, %c0_11] : memref<2x19x16xf32, #tpu.memory_space<vmem>>, vector<2x19x16xf32>
    tpu.vector_store %arg3[%c0_9, %c0_10, %c0_11], %11 {strides = array<i32>} : memref<2x19x16xf32, #tpu.memory_space<vmem>>, vector<2x19x16xf32>,
    return
  }
}

</mosaic_0001>

<bundles_post_ra>
// kernel: fused_forward.1
= control target key start
LH: loop header
LB: loop body
LE: loop exit
PB: predicated region body
PF: predicated region fallthrough
CT: control target
= control target key end

     0   :  { %vm39_vm0 = vcmask 1042432   ;;  %vm29_vm1 = vcmask 154624   ;;  %vm125_vm4 = vcmask 130048   ;;  %vm128_vm7 = vcmask 124928   ;;  %s244_s0 = inlined_call_operand.vmem [shape: f32[2,19,16], index: 0, kind: input, shape index: {}]   ;;  %s245_s1 = inlined_call_operand.vmem [shape: f32[2,19,19], index: 1, kind: input, shape index: {}]   ;;  %s246_s2 = inlined_call_operand.vmem [shape: f32[19,16], index: 2, kind: input, shape index: {}]   ;;  %s247_s3 = inlined_call_operand.vmem [shape: f32[2,19,16], index: 3, kind: output, shape index: {}]  }
   0x1   :  { %v22_v0 = vld [vmem:[%s244_s0 + $0x10] sm:$0x7]  ;;  %v25_v1 = vld [vmem:[%s244_s0 + $0x28] sm:$0x7]  ;;  %v24_v3 = vld [vmem:[%s244_s0 + $0x20] sm:$0xff] }
   0x2   :  { %v21_v2 = vld [vmem:[%s244_s0 + $0x8] sm:$0xff]  ;;  %145 = vmatpush.msk.msra.mxu2 %vm39_vm0, %v22_v0  ;;  %148 = vmatpush.msk.msra.mxu3 %vm39_vm0, %v25_v1  ;;  %v20_v4 = vld [vmem:[%s244_s0] sm:$0xff]  ;;  %v23_v5 = vld [vmem:[%s244_s0 + $0x18] sm:$0xff] }
   0x3   :  { %137 = vmatpush.msk.msra.mxu0 %vm39_vm0, %v22_v0  ;;  %141 = vmatpush.msk.msra.mxu1 %vm39_vm0, %v25_v1  ;;  %v15_v6 = vld [vmem:[%s245_s1 + $0x8] sm:$0xff]  ;;  %v18_v7 = vld [vmem:[%s245_s1 + $0x20] sm:$0xff]  ;;  %v17_v9 = vld [vmem:[%s245_s1 + $0x18] sm:$0xff] }
   0x4   :  { %146 = vmatpush.msra.mxu2 %v21_v2  ;;  %149 = vmatpush.msra.mxu3 %v24_v3  ;;  %v14_v8 = vld [vmem:[%s245_s1] sm:$0xff]  ;;  %v16_v10 = vld [vmem:[%s245_s1 + $0x10] sm:$0x7]  ;;  %v19_v11 = vld [vmem:[%s245_s1 + $0x28] sm:$0x7] }
   0x5   :  { %57 = vmatpush.msra.mxu0 %v21_v2  ;;  %95 = vmatpush.msra.mxu1 %v24_v3  ;;  %v26_v12 = vld [vmem:[%s246_s2] sm:$0xff]  ;;  %v27_v17 = vld [vmem:[%s246_s2 + $0x8] sm:$0xff]  ;;  %v28_v30 = vld [vmem:[%s246_s2 + $0x10] sm:$0x7] }
   0x6   :  { %147 = vmatpush.msra.mxu2 %v20_v4  ;;  %150 = vmatpush.msra.mxu3 %v23_v5 }
   0x7   :  { %139 = vmatmul.msk.f32.vlgmr.msra.gmra.mxu2 %vm29_vm1, %v15_v6  ;;  %143 = vmatmul.msk.f32.vlgmr.msra.gmra.mxu3 %vm29_vm1, %v18_v7 }
   0x8   :  { %58 = vmatpush.msra.mxu0 %v20_v4  ;;  %96 = vmatpush.msra.mxu1 %v23_v5 }
   0x9   :  { %138 = vmatmul.msk.f32.vlgmr.msra.gmra.mxu0 %vm29_vm1, %v14_v8  ;;  %142 = vmatmul.msk.f32.vlgmr.msra.gmra.mxu1 %vm29_vm1, %v17_v9 }
   0xf   :  { %140 = vmatmul.msk.f32.gmra.mxu2 %vm29_vm1, %v16_v10  ;;  %144 = vmatmul.msk.f32.gmra.mxu3 %vm29_vm1, %v19_v11 }
  0x86   :  { %v60_v13 = vpop.f32.mrf.mxu0  ;;  %v98_v14 = vpop.f32.mrf.mxu1 }
  0x87   :  { %v61_v15 = vadd.f32 %v60_v13, %v26_v12  ;;  %v99_v16 = vadd.f32 %v98_v14, %v26_v12 }
  0x89   :  { %vm107_vm2 = vcmp.gt.f32.partialorder %v61_v15, 0.0  ;;  %v113_v18 = vmul.f32 -0.1, %v61_v15  ;;  %vm110_vm3 = vcmp.gt.f32.partialorder %v99_v16, 0.0  ;;  %v116_v19 = vmul.f32 -0.1, %v99_v16 }
  0x8a   :  { %v63_v20 = vpop.f32.mrf.mxu2  ;;  %v101_v21 = vpop.f32.mrf.mxu3 }
  0x8b   :  { %v64_v22 = vadd.f32 %v63_v20, %v27_v17  ;;  %v102_v23 = vadd.f32 %v101_v21, %v27_v17  ;;  %v119_v24 = vsel %vm107_vm2, %v61_v15, %v113_v18  ;;  %v122_v25 = vsel %vm110_vm3, %v99_v16, %v116_v19 }
  0x8c   :  { %126 = vst.msk [vmem:[%s247_s3] sm:$0xff] %vm125_vm4, %v119_v24 }
  0x8d   :  { %vm108_vm5 = vcmp.gt.f32.partialorder %v64_v22, 0.0  ;;  %v114_v26 = vmul.f32 -0.1, %v64_v22  ;;  %vm111_vm6 = vcmp.gt.f32.partialorder %v102_v23, 0.0  ;;  %v117_v27 = vmul.f32 -0.1, %v102_v23 }
  0x8e   :  { %130 = vst.msk [vmem:[%s247_s3 + $0x18] sm:$0xff] %vm125_vm4, %v122_v25 }
  0x8f   :  { %v120_v28 = vsel %vm108_vm5, %v64_v22, %v114_v26  ;;  %v123_v29 = vsel %vm111_vm6, %v102_v23, %v117_v27 }
  0x90   :  { %127 = vst.msk [vmem:[%s247_s3 + $0x8] sm:$0xff] %vm125_vm4, %v120_v28 }
  0x91   :  { %131 = vst.msk [vmem:[%s247_s3 + $0x20] sm:$0xff] %vm125_vm4, %v123_v29 }
  0x92   :  { %v66_v31 = vpop.f32.mrf.mxu2  ;;  %v104_v32 = vpop.f32.mrf.mxu3 }
  0x93   :  { %v67_v33 = vadd.f32 %v66_v31, %v28_v30  ;;  %v105_v34 = vadd.f32 %v104_v32, %v28_v30 }
  0x95   :  { %vm109_vm8 = vcmp.gt.f32.partialorder %v67_v33, 0.0  ;;  %v115_v35 = vmul.f32 -0.1, %v67_v33  ;;  %vm112_vm9 = vcmp.gt.f32.partialorder %v105_v34, 0.0  ;;  %v118_v36 = vmul.f32 -0.1, %v105_v34 }
  0x97   :  { %v121_v37 = vsel %vm109_vm8, %v67_v33, %v115_v35  ;;  %v124_v38 = vsel %vm112_vm9, %v105_v34, %v118_v36 }
  0x98   :  { %129 = vst.msk [vmem:[%s247_s3 + $0x10] sm:$0x7] %vm128_vm7, %v121_v37 }
  0x99   :  { %132 = vst.msk [vmem:[%s247_s3 + $0x28] sm:$0x7] %vm128_vm7, %v124_v38 }

</bundles_post_ra>
